<compile_context>
chip_gen: v7x
topology: tpu7x:2x2x1
jax: 0.10.0
libtpu: 0.0.40
codegen_flags: <defaults>
</compile_context>

<pallas_src>
import jax
import jax.numpy as jnp
from jax.experimental import pallas as pl
from jax.experimental.pallas import tpu as pltpu


def _make_kernel(hw_true, hw_tile, num_s, b_tile, needs_mask):
    tail_valid = hw_true - (num_s - 1) * hw_tile   # valid lanes in the tail block
    inv_hw = 1.0 / float(hw_true)

    def kernel(x_ref, w1t_ref, w2t_ref, o_ref, sum_acc, max_acc):
        # x_ref: (B_TILE, C, HW_TILE)   w1t_ref: (C, Ch)   w2t_ref: (Ch, C)
        # o_ref: (B_TILE, C)            sum_acc/max_acc: (B_TILE, C) f32 scratch
        s = pl.program_id(1)

        @pl.when(s == 0)
        def _init():
            sum_acc[...] = jnp.zeros_like(sum_acc)
            max_acc[...] = jnp.full_like(max_acc, -jnp.inf)

        def accumulate(x_sum, x_max):
            sum_acc[...] += jnp.sum(x_sum, axis=-1, dtype=jnp.float32)
            max_acc[...] = jnp.maximum(
                max_acc[...], jnp.max(x_max, axis=-1).astype(jnp.float32))

        if needs_mask:
            # Steady state: plain (unmasked) partial reductions.
            @pl.when(s < num_s - 1)
            def _steady():
                x = x_ref[...]
                accumulate(x, x)

            # Ragged tail: out-of-range lanes of a non-dividing last block are
            # unspecified, so mask BOTH the sum (to 0) and the max (to -inf).
            @pl.when(s == num_s - 1)
            def _tail():
                x = x_ref[...]
                lane = jax.lax.broadcasted_iota(jnp.int32, x.shape, dimension=2)
                valid = lane < tail_valid
                accumulate(jnp.where(valid, x, jnp.zeros_like(x)),
                           jnp.where(valid, x, jnp.full_like(x, -jnp.inf)))
        else:
            x = x_ref[...]
            accumulate(x, x)

        @pl.when(s == num_s - 1)
        def _finalize():
            avg_p = sum_acc[...] * inv_hw        # true mean over HW
            max_p = max_acc[...]

            w1t = w1t_ref[...].astype(jnp.float32)   # (C, Ch)
            w2t = w2t_ref[...].astype(jnp.float32)   # (Ch, C)

            # Fuse both branches into a single pair of MXU dots.
            p = jnp.concatenate([avg_p, max_p], axis=0)              # (2*b_tile, C)
            h = jnp.maximum(
                jnp.dot(p, w1t, preferred_element_type=jnp.float32), 0.0)
            y = jnp.dot(h, w2t, preferred_element_type=jnp.float32)  # (2*b_tile, C)
            out = jax.nn.sigmoid(y[:b_tile] + y[b_tile:])
            o_ref[...] = out.astype(o_ref.dtype)

    return kernel


def _physical_vmem_bytes():
    """Best-effort query of physical VMEM; conservative fallback (v7x 64 MiB)."""
    try:
        info = pltpu.get_tpu_info()
        v = getattr(info, "vmem_capacity_bytes", None)
        if v:
            return int(v)
    except Exception:
        pass
    return 64 << 20


def _vmem_budgets():
    vmem = _physical_vmem_bytes()
    if vmem >= (100 << 20):
        # v5e / v6e: 128 MiB physical VMEM.
        return 20 << 20, 96 << 20       # per-x-buffer budget, vmem_limit_bytes
    # v7x (64 MiB per TensorCore) or unknown: keep total well under 64 MiB so
    # double-buffering stays intact.
    return 12 << 20, 44 << 20


def _pick_tiles(B, C, HW, itemsize, per_buffer_budget):
    # Batch tile: keep the (b_tile, C) output block layout-legal, and when
    # B >= 16 keep >= 2 batch blocks so the "parallel" axis can be split
    # across v7x's two TensorCores.
    if B <= 8:
        b_tile = B
    elif B % 8 == 0:
        b_tile = 8
    else:
        b_tile = B

    # Whole spatial extent fits in one buffer: single unmasked step, one long
    # DMA per (b, c) row.
    if b_tile * C * HW * itemsize <= per_buffer_budget:
        return b_tile, HW

    hw_tile = 128
    for cand in (4096, 2048, 1024, 512, 256, 128):
        hw_tile = cand
        if b_tile * C * hw_tile * itemsize <= per_buffer_budget:
            break
    # TODO(synk): for very large C where hw_tile would collapse below ~512,
    # tile C with an extra grid axis and do the tiny FC finalize outside the
    # kernel instead of shrinking the lane tile further.
    return b_tile, hw_tile


def channel_attention(x, w1, w2, *, hw_tile=None, b_tile=None):
    """x: (B, C, H, W) NCHW float; w1: (C//r, C); w2: (C, C//r) (PyTorch Conv2d
    1x1 weights with the trailing 1x1 squeezed out).

    Returns the sigmoid channel-attention map of shape (B, C, 1, 1)."""
    B, C, H, W = x.shape
    HW = H * W
    Ch = w1.shape[0]
    assert jnp.issubdtype(x.dtype, jnp.floating), "float inputs only"
    itemsize = jnp.dtype(x.dtype).itemsize

    per_buffer_budget, vmem_limit = _vmem_budgets()
    auto_b, auto_hw = _pick_tiles(B, C, HW, itemsize, per_buffer_budget)
    if b_tile is None:
        b_tile = auto_b
    if hw_tile is None:
        hw_tile = auto_hw

    assert B % b_tile == 0, f"b_tile={b_tile} must divide B={B}"
    num_b = B // b_tile
    num_s = pl.cdiv(HW, hw_tile)
    needs_mask = (num_s * hw_tile) != HW

    # No padding: the ragged tail block (if any) is masked inside the kernel,
    # so x is read from HBM exactly once.
    x_flat = x.reshape(B, C, HW)

    # Pre-transpose weights so the kernel's contractions need no in-kernel .T.
    w1t = w1.T  # (C, Ch)
    w2t = w2.T  # (Ch, C)

    kernel = _make_kernel(HW, hw_tile, num_s, b_tile, needs_mask)

    cost = pl.CostEstimate(
        flops=int(2 * B * C * HW + 8 * B * C * Ch),
        transcendentals=int(B * C),
        bytes_accessed=int(B * C * HW * itemsize
                           + 2 * C * Ch * jnp.dtype(w1.dtype).itemsize
                           + B * C * itemsize),
    )

    out = pl.pallas_call(
        kernel,
        out_shape=jax.ShapeDtypeStruct((B, C), x.dtype),
        grid_spec=pltpu.PrefetchScalarGridSpec(
            num_scalar_prefetch=0,
            grid=(num_b, num_s),
            in_specs=[
                pl.BlockSpec((b_tile, C, hw_tile), lambda b, s: (b, 0, s)),
                pl.BlockSpec(w1t.shape, lambda b, s: (0, 0)),
                pl.BlockSpec(w2t.shape, lambda b, s: (0, 0)),
            ],
            out_specs=pl.BlockSpec((b_tile, C), lambda b, s: (b, 0)),
            scratch_shapes=[
                pltpu.VMEM((b_tile, C), jnp.float32),  # running sum
                pltpu.VMEM((b_tile, C), jnp.float32),  # running max
            ],
        ),
        compiler_params=pltpu.CompilerParams(
            dimension_semantics=("parallel", "arbitrary"),
            vmem_limit_bytes=vmem_limit,
        ),
        cost_estimate=cost,
    )(x_flat, w1t, w2t)

    return out.reshape(B, C, 1, 1)


def _reference(x, w1, w2):
    """Plain-JAX reference mirroring the PyTorch forward."""
    avg_p = jnp.mean(x, axis=(2, 3))          # (B, C)
    max_p = jnp.max(x, axis=(2, 3))           # (B, C)

    def branch(p):
        h = jnp.maximum(p @ w1.T, 0.0)
        return h @ w2.T

    out = jax.nn.sigmoid(branch(avg_p) + branch(max_p))
    return out[:, :, None, None]


if __name__ == "__main__":
    key = jax.random.PRNGKey(0)

    # Case 1: divisible spatial extent, automatic tiling (single unmasked step).
    # Case 2: non-divisible spatial extent + forced small lane tile -> exercises
    #         multi-step accumulation and the tail-only masking path (no pad).
    # Case 3: B=16 -> two batch blocks on the "parallel" axis.
    cases = [
        dict(B=2, C=32, H=16, W=16, ratio=16, hw_tile=None),
        dict(B=2, C=64, H=20, W=20, ratio=16, hw_tile=128),
        dict(B=16, C=32, H=8, W=8, ratio=16, hw_tile=None),
    ]

    for cfg in cases:
        B, C, H, W, ratio = cfg["B"], cfg["C"], cfg["H"], cfg["W"], cfg["ratio"]
        Ch = C // ratio

        key, kx, k1, k2 = jax.random.split(key, 4)
        x = jax.random.normal(kx, (B, C, H, W), dtype=jnp.float32)
        # Deterministic synthetic Conv2d weights (out_ch, in_ch), 1x1 squeezed.
        w1 = jax.random.normal(k1, (Ch, C), dtype=jnp.float32) * 0.1
        w2 = jax.random.normal(k2, (C, Ch), dtype=jnp.float32) * 0.1

        out = channel_attention(x, w1, w2, hw_tile=cfg["hw_tile"])
        out = jax.block_until_ready(out)

        ref = _reference(x, w1, w2)
        assert out.shape == (B, C, 1, 1), out.shape
        assert jnp.allclose(out, ref, atol=1e-5, rtol=1e-5), (
            float(jnp.max(jnp.abs(out - ref))))

    print("KERNEL_OK")
</pallas_src>

<mosaic_0001>
module attributes {stable_mosaic.version = 11 : i64} {
  func.func @kernel(%arg0: i32, %arg1: i32, %arg2: memref<2x32x256xf32, #tpu.memory_space<vmem>>, %arg3: memref<32x2xf32, #tpu.memory_space<vmem>>, %arg4: memref<2x32xf32, #tpu.memory_space<vmem>>, %arg5: memref<2x32xf32, #tpu.memory_space<vmem>>, %arg6: memref<2x32xf32, #tpu.memory_space<vmem>>, %arg7: memref<2x32xf32, #tpu.memory_space<vmem>>) attributes {dimension_semantics = [#tpu.dimension_semantics<parallel>, #tpu.dimension_semantics<arbitrary>], iteration_bounds = array<i64: 1, 1>, scalar_prefetch = 0 : i64, scratch_operands = 2 : i64, tpu.core_type = #tpu.core_type<tc>, window_params = [{transform_indices = @transform_0, window_bounds = array<i64: 2, 32, 256>}, {pipeline_mode = #tpu.pipeline_mode<synchronous>, transform_indices = @transform_1, window_bounds = array<i64: 32, 2>}, {pipeline_mode = #tpu.pipeline_mode<synchronous>, transform_indices = @transform_2, window_bounds = array<i64: 2, 32>}, {transform_indices = @transform_3, window_bounds = array<i64: 2, 32>}]} {
    %c0_i32 = arith.constant 0 : i32
    %0 = arith.cmpi eq, %arg1, %c0_i32 : i32
    %1 = arith.extui %0 : i1 to i32
    %c0_i32_0 = arith.constant 0 : i32
    %2 = arith.cmpi ne, %1, %c0_i32_0 : i32
    scf.if %2 {
      %cst_14 = arith.constant 0.000000e+00 : f32
      %15 = vector.broadcast %cst_14 : f32 to vector<2x32xf32>
      %c0_15 = arith.constant 0 : index
      %c0_16 = arith.constant 0 : index
      %16 = vector.load %arg6[%c0_15, %c0_16] : memref<2x32xf32, #tpu.memory_space<vmem>>, vector<2x32xf32>
      tpu.vector_store %arg6[%c0_15, %c0_16], %15 {strides = array<i32>} : memref<2x32xf32, #tpu.memory_space<vmem>>, vector<2x32xf32>,
      %cst_17 = arith.constant 0xFF800000 : f32
      %17 = vector.broadcast %cst_17 : f32 to vector<2x32xf32>
      %c0_18 = arith.constant 0 : index
      %c0_19 = arith.constant 0 : index
      %18 = vector.load %arg7[%c0_18, %c0_19] : memref<2x32xf32, #tpu.memory_space<vmem>>, vector<2x32xf32>
      tpu.vector_store %arg7[%c0_18, %c0_19], %17 {strides = array<i32>} : memref<2x32xf32, #tpu.memory_space<vmem>>, vector<2x32xf32>,
    } else {
    }
    %c0 = arith.constant 0 : index
    %c0_1 = arith.constant 0 : index
    %c0_2 = arith.constant 0 : index
    %3 = vector.load %arg2[%c0, %c0_1, %c0_2] : memref<2x32x256xf32, #tpu.memory_space<vmem>>, vector<2x32x256xf32>
    %c0_3 = arith.constant 0 : index
    %c0_4 = arith.constant 0 : index
    %4 = vector.load %arg6[%c0_3, %c0_4] : memref<2x32xf32, #tpu.memory_space<vmem>>, vector<2x32xf32>
    %cst = arith.constant dense<0.000000e+00> : vector<2x32xf32>
    %5 = vector.multi_reduction <add>, %3, %cst [2] : vector<2x32x256xf32> to vector<2x32xf32>
    %6 = arith.addf %4, %5 : vector<2x32xf32>
    %c0_5 = arith.constant 0 : index
    %c0_6 = arith.constant 0 : index
    %7 = vector.load %arg6[%c0_5, %c0_6] : memref<2x32xf32, #tpu.memory_space<vmem>>, vector<2x32xf32>
    tpu.vector_store %arg6[%c0_5, %c0_6], %6 {strides = array<i32>} : memref<2x32xf32, #tpu.memory_space<vmem>>, vector<2x32xf32>,
    %c0_7 = arith.constant 0 : index
    %c0_8 = arith.constant 0 : index
    %8 = vector.load %arg7[%c0_7, %c0_8] : memref<2x32xf32, #tpu.memory_space<vmem>>, vector<2x32xf32>
    %cst_9 = arith.constant dense<0xFF800000> : vector<2x32xf32>
    %9 = vector.multi_reduction <maximumf>, %3, %cst_9 [2] : vector<2x32x256xf32> to vector<2x32xf32>
    %10 = arith.maximumf %8, %9 : vector<2x32xf32>
    %c0_10 = arith.constant 0 : index
    %c0_11 = arith.constant 0 : index
    %11 = vector.load %arg7[%c0_10, %c0_11] : memref<2x32xf32, #tpu.memory_space<vmem>>, vector<2x32xf32>
    tpu.vector_store %arg7[%c0_10, %c0_11], %10 {strides = array<i32>} : memref<2x32xf32, #tpu.memory_space<vmem>>, vector<2x32xf32>,
    %c0_i32_12 = arith.constant 0 : i32
    %12 = arith.cmpi eq, %arg1, %c0_i32_12 : i32
    %13 = arith.extui %12 : i1 to i32
    %c0_i32_13 = arith.constant 0 : i32
    %14 = arith.cmpi ne, %13, %c0_i32_13 : i32
    scf.if %14 {
      %c0_14 = arith.constant 0 : index
      %c0_15 = arith.constant 0 : index
      %15 = vector.load %arg6[%c0_14, %c0_15] : memref<2x32xf32, #tpu.memory_space<vmem>>, vector<2x32xf32>
      %cst_16 = arith.constant 3.906250e-03 : f32
      %16 = vector.broadcast %cst_16 : f32 to vector<2x32xf32>
      %17 = arith.mulf %15, %16 : vector<2x32xf32>
      %c0_17 = arith.constant 0 : index
      %c0_18 = arith.constant 0 : index
      %18 = vector.load %arg7[%c0_17, %c0_18] : memref<2x32xf32, #tpu.memory_space<vmem>>, vector<2x32xf32>
      %c0_19 = arith.constant 0 : index
      %c0_20 = arith.constant 0 : index
      %19 = vector.load %arg3[%c0_19, %c0_20] : memref<32x2xf32, #tpu.memory_space<vmem>>, vector<32x2xf32>
      %c0_21 = arith.constant 0 : index
      %c0_22 = arith.constant 0 : index
      %20 = vector.load %arg4[%c0_21, %c0_22] : memref<2x32xf32, #tpu.memory_space<vmem>>, vector<2x32xf32>
      %21 = tpu.concatenate %17, %18 in 0 : vector<2x32xf32>, vector<2x32xf32> -> vector<4x32xf32>
      %cst_23 = arith.constant dense<0.000000e+00> : vector<4x2xf32>
      %22 = tpu.matmul %21, %19, %cst_23 {dimension_numbers = #tpu.dot_dimension_numbers<[1], [0], [0], [1], [0, 0, 1, 1], [], []>} : vector<4x32xf32>, vector<32x2xf32>, vector<4x2xf32> -> vector<4x2xf32>
      %cst_24 = arith.constant 0.000000e+00 : f32
      %23 = vector.broadcast %cst_24 : f32 to vector<4x2xf32>
      %24 = arith.maximumf %22, %23 : vector<4x2xf32>
      %cst_25 = arith.constant dense<0.000000e+00> : vector<4x32xf32>
      %25 = tpu.matmul %24, %20, %cst_25 {dimension_numbers = #tpu.dot_dimension_numbers<[1], [0], [0], [1], [0, 0, 1, 1], [], []>} : vector<4x2xf32>, vector<2x32xf32>, vector<4x32xf32> -> vector<4x32xf32>
      %26 = vector.extract_strided_slice %25 {offsets = [0, 0], sizes = [2, 32], strides = [1, 1]} : vector<4x32xf32> to vector<2x32xf32>
      %27 = vector.extract_strided_slice %25 {offsets = [2, 0], sizes = [2, 32], strides = [1, 1]} : vector<4x32xf32> to vector<2x32xf32>
      %28 = arith.addf %26, %27 : vector<2x32xf32>
      %29 = arith.negf %28 : vector<2x32xf32>
      %30 = math.exp %29 : vector<2x32xf32>
      %cst_26 = arith.constant 1.000000e+00 : f32
      %31 = vector.broadcast %cst_26 : f32 to vector<2x32xf32>
      %32 = arith.addf %31, %30 : vector<2x32xf32>
      %33 = arith.divf %31, %32 : vector<2x32xf32>
      %c0_27 = arith.constant 0 : index
      %c0_28 = arith.constant 0 : index
      %34 = vector.load %arg5[%c0_27, %c0_28] : memref<2x32xf32, #tpu.memory_space<vmem>>, vector<2x32xf32>
      tpu.vector_store %arg5[%c0_27, %c0_28], %33 {strides = array<i32>} : memref<2x32xf32, #tpu.memory_space<vmem>>, vector<2x32xf32>,
    } else {
    }
    return
  }
  func.func @transform_0(%arg0: i32, %arg1: i32) -> (i32, i32, i32) {
    %c0_i32 = arith.constant 0 : i32
    %c0_i32_0 = arith.constant 0 : i32
    return %arg0, %c0_i32, %arg1 : i32, i32, i32
  }
  func.func @transform_1(%arg0: i32, %arg1: i32) -> (i32, i32) {
    %c0_i32 = arith.constant 0 : i32
    %c0_i32_0 = arith.constant 0 : i32
    %c0_i32_1 = arith.constant 0 : i32
    return %c0_i32, %c0_i32_0 : i32, i32
  }
  func.func @transform_2(%arg0: i32, %arg1: i32) -> (i32, i32) {
    %c0_i32 = arith.constant 0 : i32
    %c0_i32_0 = arith.constant 0 : i32
    %c0_i32_1 = arith.constant 0 : i32
    return %c0_i32, %c0_i32_0 : i32, i32
  }
  func.func @transform_3(%arg0: i32, %arg1: i32) -> (i32, i32) {
    %c0_i32 = arith.constant 0 : i32
    %c0_i32_0 = arith.constant 0 : i32
    return %arg0, %c0_i32 : i32, i32
  }
}

</mosaic_0001>

<bundles_post_ra>
// kernel: tpu_custom_call.1
= control target key start
LH: loop header
LB: loop body
LE: loop exit
PB: predicated region body
PF: predicated region fallthrough
CT: control target
= control target key end

     0   :  { %8 = vsyncpa [#allocation5], 0  ;;  %s585_s0 = inlined_call_operand.hbm [shape: f32[2,32,256], index: 0, kind: input, shape index: {}]   ;;  %s586_s1 = inlined_call_operand.vmem [shape: f32[32,2], index: 1, kind: input, shape index: {}]   ;;  %s587_s2 = inlined_call_operand.vmem [shape: f32[2,32], index: 2, kind: input, shape index: {}]   ;;  %s588_s3 = inlined_call_operand.hbm [shape: f32[2,32], index: 3, kind: output, shape index: {}]  }
   0x1   :  { %9 = vsyncpa [#allocation6], 0  ;;  %s499_s12 = smov [#allocation4]   ;;  %s451_s16 = scalar_lea.hbm %s585_s0, 2048 }
   0x2   :  { %s15_s13 = sshll.u32 %s499_s12, 4  ;;  %p452_p0 = scmp.ne.s32.totalorder %s585_s0, %s451_s16  ;;  %s16_s13 = int_to_ptr.vmem [resolvable:$true] %s15_s13 }
   0x3   :  { %p455_p1 = scmp.lt.u32.totalorder %s451_s16, %s585_s0 }
   0x5   :  { %p457_p2 = pnand %p455_p1, %p452_p0 }
   0x7   :  { %460 = shalt.err (!%p457_p2)
}
   0x8   :  { %s461_s21 = scalar_lea.vmem %s16_s13, 2048  ;;  %p466_p4 = scmp.lt.s32.totalorder %s16_s13, %s16_s13 }
   0x9   :  { %p462_p3 = scmp.ne.s32.totalorder %s16_s13, %s461_s21  ;;  %p467_p5 = scmp.lt.s32.totalorder %s461_s21, %s461_s21 }
   0xb   :  { %p468_p6 = por %p467_p5, %p466_p4 }
   0xd   :  { %p469_p7 = pnand %p468_p6, %p462_p3 }
   0xf   :  { %472 = shalt.err (!%p469_p7)
}
  0x10   :  { %s500_s22 = smov 256   ;;  %s501_s23 = smov 16  }
  0x11   :  { %21 = dma.hbm_to_vmem [thread:$0]  %s585_s0, 2048, %s16_s13, [#allocation5], %s500_s22, %s500_s22, %s501_s23  }
  0x12   :  { %495 = dma.done.wait [#allocation5], 2048  }
  0x13   :  { %496 = vsyncadd [#allocation5], 4294965248  ;;  %v44_v0 = vld [vmem:[#allocation4 + $0x40] sm:$0xff]  ;;  %v45_v1 = vld [vmem:[#allocation4 + $0x48] sm:$0xff]  ;;  %vm33_vm0 = vcmask 254976   ;;  %v502_v32 = vmov 0.0   ;;  %v85_v45 = vlaneseq }
  0x14   :  { %v36_v2 = vld [vmem:[#allocation4] sm:$0xff]  ;;  %v65_v3 = vadd.f32 %v45_v1, %v44_v0  ;;  %v37_v4 = vld [vmem:[#allocation4 + $0x8] sm:$0xff]  ;;  %v46_v5 = vld [vmem:[#allocation4 + $0x50] sm:$0xff]  ;;  %v150_v15 = vmax.f32 %v44_v0, %v45_v1  ;;  %34 = vst.msk [vmem:[#allocation2] sm:$0x3] %vm33_vm0, %v502_v32  ;;  %428 = vmatprep.subr.mxu1 %v502_v32  ;;  %v503_v33 = vmov -inf  }
  0x15   :  { %v47_v6 = vld [vmem:[#allocation4 + $0x58] sm:$0xff]  ;;  %v53_v7 = vadd.f32 %v37_v4, %v36_v2  ;;  %v38_v8 = vld [vmem:[#allocation4 + $0x10] sm:$0xff]  ;;  %v138_v13 = vmax.f32 %v36_v2, %v37_v4  ;;  %v48_v16 = vld [vmem:[#allocation4 + $0x60] sm:$0xff]  ;;  %35 = vst.msk [vmem:[#allocation3] sm:$0x3] %vm33_vm0, %v503_v33  ;;  %v504_v37 = vmov 0.0|0.0  }
  0x16   :  { %v39_v9 = vld [vmem:[#allocation4 + $0x18] sm:$0xff]  ;;  %66 = vadd.xlane.f32.xlu1 %v65_v3  ;;  %v68_v10 = vadd.f32 %v47_v6, %v46_v5  ;;  %v153_v14 = vmax.f32 %v46_v5, %v47_v6  ;;  %v49_v17 = vld [vmem:[#allocation4 + $0x68] sm:$0xff]  ;;  %v40_v18 = vld [vmem:[#allocation4 + $0x20] sm:$0xff]  ;;  %433 = vmatprep.subr.bf16.mxu0 %v504_v37  ;;  %vm505_vm1 = vmmov 0   ;;  %v86_v48 = vand.u32 127, %v85_v45  ;;  %s506_s7 = smov [#allocation7]  }
  0x17   :  { %54 = vadd.xlane.f32.xlu0 %v53_v7  ;;  %v56_v11 = vadd.f32 %v39_v9, %v38_v8  ;;  %v141_v12 = vmax.f32 %v38_v8, %v39_v9  ;;  %v41_v19 = vld [vmem:[#allocation4 + $0x28] sm:$0xff]  ;;  %v71_v20 = vadd.f32 %v49_v17, %v48_v16  ;;  %v156_v22 = vmax.f32 %v48_v16, %v49_v17  ;;  %v50_v24 = vld [vmem:[#allocation4 + $0x70] sm:$0xff]  ;;  %v51_v25 = vld [vmem:[#allocation4 + $0x78] sm:$0xff]  ;;  %s397_s8 = sshll.u32 %s506_s7, 4  ;;  %s398_s8 = int_to_ptr.vmem [resolvable:$true] %s397_s8 }
  0x18   :  { %v59_v21 = vadd.f32 %v41_v19, %v40_v18  ;;  %v144_v23 = vmax.f32 %v40_v18, %v41_v19  ;;  %v42_v26 = vld [vmem:[#allocation4 + $0x30] sm:$0xff]  ;;  %v43_v27 = vld [vmem:[#allocation4 + $0x38] sm:$0xff]  ;;  %v74_v28 = vadd.f32 %v51_v25, %v50_v24  ;;  %v159_v30 = vmax.f32 %v50_v24, %v51_v25  ;;  %v219_v35 = vld [vmem:[%s586_s1 + $0x8] sm:$0xff]  ;;  %425 = vmatprep.mubr.msk.f32.mxu0 %vm505_vm1, %v502_v32  ;;  %p478_p9 = scmp.lt.s32.totalorder %s398_s8, %s398_s8 }
  0x19   :  { %v62_v29 = vadd.f32 %v43_v27, %v42_v26  ;;  %v147_v31 = vmax.f32 %v42_v26, %v43_v27  ;;  %v218_v34 = vld [vmem:[%s586_s1] sm:$0xff]  ;;  %v220_v36 = vld [vmem:[%s586_s1 + $0x10] sm:$0xff]  ;;  %v221_v39 = vld [vmem:[%s586_s1 + $0x18] sm:$0xff]  ;;  %430 = vmatprep.mubr.msk.f32.mxu1 %vm505_vm1, %v502_v32  ;;  %v91_v49 = vadd.s32 4294967288, %v86_v48  ;;  %v88_v52 = vshrl.u32 %v85_v45, 7 }
  0x1a   :  { %69 = vadd.xlane.f32.xlu1 %v68_v10  ;;  %v434_v38 = vpack.c.bf16 %v219_v35, %v218_v34  ;;  %v437_v40 = vpack.c.bf16 %v221_v39, %v220_v36  ;;  %v98_v53 = vadd.s32 4294967280, %v86_v48  ;;  %v105_v57 = vadd.s32 4294967272, %v86_v48 }
  0x1b   :  { %57 = vadd.xlane.f32.xlu0 %v56_v11  ;;  %v94_v54 = vsub.s32 %v91_v49, %v88_v52  ;;  %v89_v58 = vsub.s32 %v86_v48, %v88_v52  ;;  %vm96_vm2 = vcmask 130112   ;;  %vm103_vm3 = vcmask 195712  }
  0x1c   :  { %435 = vmatpush3.bf16.msra.mxu0 %v434_v38  ;;  %v101_v59 = vsub.s32 %v98_v53, %v88_v52  ;;  %v108_v0 = vsub.s32 %v105_v57, %v88_v52  ;;  %vm110_vm4 = vcmask 261312   ;;  %vm131_vm5 = vcmask 1041409   ;;  %v137_v33 = vld [vmem:[#allocation3] sm:$0x3] }
  0x1d   :  { %436 = vmatprep.subr.bf16.mxu0 %v504_v37  ;;  %vm226_vm6 = vcmask 1041408   ;;  %vm228_vm7 = vcmask 261120   ;;  %vm303_vm8 = vcmask 15360  }
  0x1e   :  { %142 = vmax.xlane.f32.xlu1 %v141_v12 }
  0x1f   :  { %139 = vmax.xlane.f32.xlu0 %v138_v13 }
  0x20   :  { %438 = vmatpush3.bf16.msra.mxu0 %v437_v40 }
  0x22   :  { %154 = vmax.xlane.f32.xlu1 %v153_v14 }
  0x23   :  { %151 = vmax.xlane.f32.xlu0 %v150_v15 }
  0x26   :  { %72 = vadd.xlane.f32.xlu1 %v71_v20  ;;  %v52_v20 = vld [vmem:[#allocation2] sm:$0x3] }
  0x27   :  { %60 = vadd.xlane.f32.xlu0 %v59_v21 }
  0x2a   :  { %157 = vmax.xlane.f32.xlu1 %v156_v22 }
  0x2b   :  { %145 = vmax.xlane.f32.xlu0 %v144_v23 }
  0x2e   :  { %75 = vadd.xlane.f32.xlu1 %v74_v28 }
  0x2f   :  { %63 = vadd.xlane.f32.xlu0 %v62_v29 }
  0x32   :  { %160 = vmax.xlane.f32.xlu1 %v159_v30 }
  0x33   :  { %148 = vmax.xlane.f32.xlu0 %v147_v31 }
  0xa3   :  { %v67_v41 = vpop.xlane.xlu1 %66 }
  0xa4   :  { %v55_v42 = vpop.xlane.xlu0 %54  ;;  %v115_v1 = vrot.slane %v67_v41, %v89_v58 }
  0xa5   :  { %v90_v2 = vrot.slane %v55_v42, %v89_v58  ;;  %v222_v42 = vld [vmem:[%s587_s2] sm:$0x3]  ;;  %s473_s2 = scalar_lea.vmem %s398_s8, 32 }
  0xa6   :  { %429 = vmatpush3.msk.msra.mxu1 %vm226_vm6, %v222_v42  ;;  %p474_p8 = scmp.ne.s32.totalorder %s398_s8, %s473_s2  ;;  %p479_p10 = scmp.lt.s32.totalorder %s473_s2, %s473_s2 }
  0xa7   :  { %v70_v43 = vpop.xlane.xlu1 %69 }
  0xa8   :  { %v58_v44 = vpop.xlane.xlu0 %57  ;;  %v119_v60 = vrot.slane %v70_v43, %v94_v54  ;;  %p480_p11 = por %p479_p10, %p478_p9 }
  0xa9   :  { %v95_v61 = vrot.slane %v58_v44, %v94_v54 }
  0xaa   :  { %v120_v5 = vsel %vm96_vm2, %v119_v60, %v115_v1  ;;  %p481_p12 = pnand %p480_p11, %p474_p8 }
  0xab   :  { %v143_v46 = vpop.xlane.xlu1 %142  ;;  %v97_v6 = vsel %vm96_vm2, %v95_v61, %v90_v2 }
  0xac   :  { %v140_v47 = vpop.xlane.xlu0 %139  ;;  %v177_v8 = vrot.slane %v143_v46, %v94_v54 }
  0xad   :  { %v173_v13 = vrot.slane %v140_v47, %v89_v58 }
  0xaf   :  { %v155_v50 = vpop.xlane.xlu1 %154  ;;  %v178_v27 = vsel %vm96_vm2, %v177_v8, %v173_v13 }
  0xb0   :  { %v152_v51 = vpop.xlane.xlu0 %151  ;;  %v196_v9 = vrot.slane %v155_v50, %v94_v54 }
  0xb1   :  { %v192_v10 = vrot.slane %v152_v51, %v89_v58 }
  0xb3   :  { %v73_v55 = vpop.xlane.xlu1 %72  ;;  %v197_v23 = vsel %vm96_vm2, %v196_v9, %v192_v10 }
  0xb4   :  { %v61_v56 = vpop.xlane.xlu0 %60  ;;  %v124_v3 = vrot.slane %v73_v55, %v101_v59 }
  0xb5   :  { %v102_v4 = vrot.slane %v61_v56, %v101_v59 }
  0xb6   :  { %v125_v14 = vsel %vm103_vm3, %v124_v3, %v120_v5 }
  0xb7   :  { %v158_v62 = vpop.xlane.xlu1 %157  ;;  %v104_v17 = vsel %vm103_vm3, %v102_v4, %v97_v6 }
  0xb8   :  { %v146_v63 = vpop.xlane.xlu0 %145  ;;  %v201_v15 = vrot.slane %v158_v62, %v101_v59 }
  0xb9   :  { %v182_v18 = vrot.slane %v146_v63, %v101_v59 }
  0xba   :  { %v202_v28 = vsel %vm103_vm3, %v201_v15, %v197_v23 }
  0xbb   :  { %v76_v7 = vpop.xlane.xlu1 %75  ;;  %v183_v31 = vsel %vm103_vm3, %v182_v18, %v178_v27 }
  0xbc   :  { %v129_v11 = vrot.slane %v76_v7, %v108_v0  ;;  %v64_v12 = vpop.xlane.xlu0 %63 }
  0xbd   :  { %v109_v16 = vrot.slane %v64_v12, %v108_v0 }
  0xbe   :  { %v130_v19 = vsel %vm110_vm4, %v129_v11, %v125_v14 }
  0xbf   :  { %v111_v21 = vsel %vm110_vm4, %v109_v16, %v104_v17  ;;  %v161_v22 = vpop.xlane.xlu1 %160 }
  0xc0   :  { %v132_v24 = vsel %vm131_vm5, %v130_v19, %v111_v21  ;;  %v206_v25 = vrot.slane %v161_v22, %v108_v0  ;;  %v149_v26 = vpop.xlane.xlu0 %148 }
  0xc1   :  { %v187_v29 = vrot.slane %v149_v26, %v108_v0  ;;  %v134_v30 = vadd.f32 %v132_v24, %v52_v20 }
  0xc2   :  { %v207_v32 = vsel %vm110_vm4, %v206_v25, %v202_v28 }
  0xc3   :  { %v188_v34 = vsel %vm110_vm4, %v187_v29, %v183_v31  ;;  %136 = vst.msk [vmem:[#allocation2] sm:$0x3] %vm33_vm0, %v134_v30 }
  0xc4   :  { %v208_v35 = vsel %vm131_vm5, %v207_v32, %v188_v34 }
  0xc5   :  { %v210_v36 = vmax.f32 %v137_v33, %v208_v35 }
  0xc7   :  { %211 = vst.msk [vmem:[#allocation3] sm:$0x3] %vm33_vm0, %v210_v36 }
  0xca   :  { %v215_v37 = vld [vmem:[#allocation2] sm:$0x3] }
  0xcb   :  { %v216_v39 = vmul.f32 0.00390625, %v215_v37 }
  0xce   :  { %v217_v38 = vld [vmem:[#allocation3] sm:$0x3] }
  0xcf   :  { %v224_v40 = vrot.slane %v217_v38, 6 }
  0xd1   :  { %v227_v41 = vsel %vm226_vm6, %v216_v39, %v224_v40 }
  0xd2   :  { %426 = vmatmul.mubr.msk.f32.vlgmr.msra.gmra.mrb[0].mxu0 %vm228_vm7, %v227_v41 }
 0x1a5   :  { %v298_v43 = vpop.f32.mrb[0].mxu0 }
 0x1a6   :  { %v302_v44 = vmax.f32 %v298_v43, 0.0  ;;  %v427_v45 = vpop.f32.mrb[1].mxu0 }
 0x1a8   :  { %431 = vmatmul.mubr.msk.f32.vlgmr.msra.gmra.mrb[0].mxu1 %vm303_vm8, %v302_v44 }
 0x27b   :  { %v376_v46 = vpop.f32.mrb[0].mxu1 }
 0x27c   :  { %v381_v47 = vrot.slane %v376_v46, 2  ;;  %v432_v48 = vpop.f32.mrb[1].mxu1 }
 0x27e   :  { %v383_v49 = vadd.f32 %v381_v47, %v376_v46 }
 0x280   :  { %v409_v50 = vmul.f32 -1.442695, %v383_v49 }
 0x282   :  { %447 = vpow2.f32 %v409_v50 }
 0x28c   :  { %v448_v51 = vpop.eup %447 }
 0x28d   :  { %v387_v52 = vadd.f32 1.0, %v448_v51 }
 0x28f   :  { %449 = vrcp.f32 %v387_v52 }
 0x299   :  { %v450_v53 = vpop.eup %449 }
 0x29a   :  { %390 = vst.msk [vmem:[#allocation7] sm:$0x3] %vm33_vm0, %v450_v53 }
 0x29b   :  { %484 = shalt.err (!%p481_p12)
}
 0x29c   :  { %s485_s11 = scalar_lea.hbm %s588_s3, 32 }
 0x29d   :  { %p486_p13 = scmp.ne.s32.totalorder %s588_s3, %s485_s11  ;;  %p489_p0 = scmp.lt.u32.totalorder %s485_s11, %s588_s3 }
 0x29f   :  { %p491_p1 = pnand %p489_p0, %p486_p13 }
 0x2a1   :  { %494 = shalt.err (!%p491_p1)
}
 0x2a2   :  { %400 = dma.vmem_to_hbm [thread:$0]  %s398_s8, 32, %s588_s3, [#allocation6]  }
 0x2a3   :  { %497 = dma.done.wait [#allocation6], 32  }
 0x2a4   :  { %498 = vsyncadd [#allocation6], 4294967264 }
 0x2a5   :  { %404 = vsyncpa [#allocation5], 1 }
 0x2a6   :  { %405 = vsyncpa [#allocation6], 1 }

</bundles_post_ra>
